<compile_context>
chip_gen: v7x
topology: tpu7x:2x2x1
jax: 0.10.0
libtpu: 0.0.40
codegen_flags: <defaults>
</compile_context>

<pallas_src>
import jax
import jax.numpy as jnp
from jax.experimental import pallas as pl
from jax.experimental.pallas import tpu as pltpu

C = 32            # channels after pixel_shuffle
HW = 32 * 32      # flattened spatial (j,k)
CHUNK = 128       # full lane width per chunk


def _fused_permute_add_kernel(a_ref, d_ref, out_ref):
    # a_ref  : (1024, 32) view of v1:  a[j*32+k, i] = v1[0, j, k, i]
    # d_ref  : (32, 1024) view of v1:  d[i, j*32+k] = v1[0, i, j, k]
    # out_ref: (32, 1024):           out[i, j*32+k] = v1[0,j,k,i] + v1[0,i,j,k] + 3
    for c in range(HW // CHUNK):                 # 8 static (unrolled) chunks
        s = c * CHUNK
        t_blk = a_ref[pl.ds(s, CHUNK), :].T      # (32, 128) minor 2-D transpose (XLU)
        out_ref[:, pl.ds(s, CHUNK)] = (          # lane-dense, unmasked full-width store
            t_blk + d_ref[:, pl.ds(s, CHUNK)] + 3.0
        )


def _pixel_shuffle(x, r):
    n, c, h, w = x.shape
    oc = c // (r * r)
    x = x.reshape(n, oc, r, r, h, w)
    x = jnp.transpose(x, (0, 1, 4, 2, 5, 3))
    return x.reshape(n, oc, h * r, w * r)


@jax.jit
def model_forward(x1):
    # TODO(synk): pixel_shuffle is a 6-D permute; kept as XLA data-movement glue
    # instead of fusing it into the kernel (no clean/robust in-kernel equivalent).
    v1 = _pixel_shuffle(x1, 4)                   # (1, 32, 32, 32)
    v2 = v1.reshape(1, C, 32, 32)                # module's reshape (no-op here)

    # TODO(synk): F.conv_transpose3d(v4, weight=None, bias=None, ...) has no defined
    # PyTorch semantics (weight must be a Tensor, it raises); treated as identity.

    # Two free (bitcast) views of the same data feed the kernel once each:
    a = v2.reshape(HW, C)        # a[j*32+k, i] = v2[0, j, k, i]  (transpose operand)
    d = v2.reshape(C, HW)        # d[i, j*32+k] = v2[0, i, j, k]  (direct operand, lane-dense)

    out2d = pl.pallas_call(
        _fused_permute_add_kernel,
        out_shape=jax.ShapeDtypeStruct((C, HW), v2.dtype),
        in_specs=[
            pl.BlockSpec(memory_space=pltpu.MemorySpace.VMEM),
            pl.BlockSpec(memory_space=pltpu.MemorySpace.VMEM),
        ],
        out_specs=pl.BlockSpec(memory_space=pltpu.MemorySpace.VMEM),
    )(a, d)
    return out2d.reshape(1, C, 32, 32)


def _reference(x1):
    v1 = _pixel_shuffle(x1, 4)
    v2 = v1.reshape(1, 32, 32, 32)
    v3 = jnp.swapaxes(v2, 2, 3)
    v4 = jnp.swapaxes(v3, 1, 2)
    v5 = v4            # conv_transpose3d(weight=None) -> identity (see TODO above)
    v6 = v5 + 3
    v7 = v6 + v1
    return v7


if __name__ == "__main__":
    # NOTE: the module's own reshape to (1, 32, 32, 32) forces x1 = (1, 512, 8, 8)
    # (pixel_shuffle(x1, 4) must yield 32768 elements); the (1, 16, 8, 8) sample in
    # the original file is inconsistent with its forward.
    key = jax.random.PRNGKey(0)
    x1 = jax.random.normal(key, (1, 512, 8, 8), dtype=jnp.float32)

    out = jax.block_until_ready(model_forward(x1))
    ref = _reference(x1)

    assert out.shape == (1, 32, 32, 32)
    assert out.dtype == jnp.float32
    assert jnp.allclose(out, ref, atol=1e-5, rtol=1e-5)
    print("KERNEL_OK")
</pallas_src>

<mosaic_0001>
module attributes {stable_mosaic.version = 11 : i64} {
  func.func @_fused_permute_add_kernel(%arg0: memref<1024x32xf32, #tpu.memory_space<vmem>>, %arg1: memref<32x1024xf32, #tpu.memory_space<vmem>>, %arg2: memref<32x1024xf32, #tpu.memory_space<vmem>>) attributes {dimension_semantics = [], scalar_prefetch = 0 : i64, scratch_operands = 0 : i64, tpu.core_type = #tpu.core_type<tc>} {
    %c0 = arith.constant 0 : index
    %c0_0 = arith.constant 0 : index
    %0 = vector.load %arg0[%c0, %c0_0] : memref<1024x32xf32, #tpu.memory_space<vmem>>, vector<128x32xf32>
    %1 = tpu.transpose %0, [1, 0] : vector<128x32xf32> -> vector<32x128xf32>
    %c0_1 = arith.constant 0 : index
    %c0_2 = arith.constant 0 : index
    %2 = vector.load %arg1[%c0_1, %c0_2] : memref<32x1024xf32, #tpu.memory_space<vmem>>, vector<32x128xf32>
    %3 = arith.addf %1, %2 : vector<32x128xf32>
    %cst = arith.constant 3.000000e+00 : f32
    %4 = vector.broadcast %cst : f32 to vector<32x128xf32>
    %5 = arith.addf %3, %4 : vector<32x128xf32>
    %c0_3 = arith.constant 0 : index
    %c0_4 = arith.constant 0 : index
    %6 = vector.load %arg2[%c0_3, %c0_4] : memref<32x1024xf32, #tpu.memory_space<vmem>>, vector<32x128xf32>
    tpu.vector_store %arg2[%c0_3, %c0_4], %5 {strides = array<i32>} : memref<32x1024xf32, #tpu.memory_space<vmem>>, vector<32x128xf32>,
    %c128 = arith.constant 128 : index
    %c0_5 = arith.constant 0 : index
    %7 = vector.load %arg0[%c128, %c0_5] : memref<1024x32xf32, #tpu.memory_space<vmem>>, vector<128x32xf32>
    %8 = tpu.transpose %7, [1, 0] : vector<128x32xf32> -> vector<32x128xf32>
    %c0_6 = arith.constant 0 : index
    %c128_7 = arith.constant 128 : index
    %9 = vector.load %arg1[%c0_6, %c128_7] : memref<32x1024xf32, #tpu.memory_space<vmem>>, vector<32x128xf32>
    %10 = arith.addf %8, %9 : vector<32x128xf32>
    %cst_8 = arith.constant 3.000000e+00 : f32
    %11 = vector.broadcast %cst_8 : f32 to vector<32x128xf32>
    %12 = arith.addf %10, %11 : vector<32x128xf32>
    %c0_9 = arith.constant 0 : index
    %c128_10 = arith.constant 128 : index
    %13 = vector.load %arg2[%c0_9, %c128_10] : memref<32x1024xf32, #tpu.memory_space<vmem>>, vector<32x128xf32>
    tpu.vector_store %arg2[%c0_9, %c128_10], %12 {strides = array<i32>} : memref<32x1024xf32, #tpu.memory_space<vmem>>, vector<32x128xf32>,
    %c256 = arith.constant 256 : index
    %c0_11 = arith.constant 0 : index
    %14 = vector.load %arg0[%c256, %c0_11] : memref<1024x32xf32, #tpu.memory_space<vmem>>, vector<128x32xf32>
    %15 = tpu.transpose %14, [1, 0] : vector<128x32xf32> -> vector<32x128xf32>
    %c0_12 = arith.constant 0 : index
    %c256_13 = arith.constant 256 : index
    %16 = vector.load %arg1[%c0_12, %c256_13] : memref<32x1024xf32, #tpu.memory_space<vmem>>, vector<32x128xf32>
    %17 = arith.addf %15, %16 : vector<32x128xf32>
    %cst_14 = arith.constant 3.000000e+00 : f32
    %18 = vector.broadcast %cst_14 : f32 to vector<32x128xf32>
    %19 = arith.addf %17, %18 : vector<32x128xf32>
    %c0_15 = arith.constant 0 : index
    %c256_16 = arith.constant 256 : index
    %20 = vector.load %arg2[%c0_15, %c256_16] : memref<32x1024xf32, #tpu.memory_space<vmem>>, vector<32x128xf32>
    tpu.vector_store %arg2[%c0_15, %c256_16], %19 {strides = array<i32>} : memref<32x1024xf32, #tpu.memory_space<vmem>>, vector<32x128xf32>,
    %c384 = arith.constant 384 : index
    %c0_17 = arith.constant 0 : index
    %21 = vector.load %arg0[%c384, %c0_17] : memref<1024x32xf32, #tpu.memory_space<vmem>>, vector<128x32xf32>
    %22 = tpu.transpose %21, [1, 0] : vector<128x32xf32> -> vector<32x128xf32>
    %c0_18 = arith.constant 0 : index
    %c384_19 = arith.constant 384 : index
    %23 = vector.load %arg1[%c0_18, %c384_19] : memref<32x1024xf32, #tpu.memory_space<vmem>>, vector<32x128xf32>
    %24 = arith.addf %22, %23 : vector<32x128xf32>
    %cst_20 = arith.constant 3.000000e+00 : f32
    %25 = vector.broadcast %cst_20 : f32 to vector<32x128xf32>
    %26 = arith.addf %24, %25 : vector<32x128xf32>
    %c0_21 = arith.constant 0 : index
    %c384_22 = arith.constant 384 : index
    %27 = vector.load %arg2[%c0_21, %c384_22] : memref<32x1024xf32, #tpu.memory_space<vmem>>, vector<32x128xf32>
    tpu.vector_store %arg2[%c0_21, %c384_22], %26 {strides = array<i32>} : memref<32x1024xf32, #tpu.memory_space<vmem>>, vector<32x128xf32>,
    %c512 = arith.constant 512 : index
    %c0_23 = arith.constant 0 : index
    %28 = vector.load %arg0[%c512, %c0_23] : memref<1024x32xf32, #tpu.memory_space<vmem>>, vector<128x32xf32>
    %29 = tpu.transpose %28, [1, 0] : vector<128x32xf32> -> vector<32x128xf32>
    %c0_24 = arith.constant 0 : index
    %c512_25 = arith.constant 512 : index
    %30 = vector.load %arg1[%c0_24, %c512_25] : memref<32x1024xf32, #tpu.memory_space<vmem>>, vector<32x128xf32>
    %31 = arith.addf %29, %30 : vector<32x128xf32>
    %cst_26 = arith.constant 3.000000e+00 : f32
    %32 = vector.broadcast %cst_26 : f32 to vector<32x128xf32>
    %33 = arith.addf %31, %32 : vector<32x128xf32>
    %c0_27 = arith.constant 0 : index
    %c512_28 = arith.constant 512 : index
    %34 = vector.load %arg2[%c0_27, %c512_28] : memref<32x1024xf32, #tpu.memory_space<vmem>>, vector<32x128xf32>
    tpu.vector_store %arg2[%c0_27, %c512_28], %33 {strides = array<i32>} : memref<32x1024xf32, #tpu.memory_space<vmem>>, vector<32x128xf32>,
    %c640 = arith.constant 640 : index
    %c0_29 = arith.constant 0 : index
    %35 = vector.load %arg0[%c640, %c0_29] : memref<1024x32xf32, #tpu.memory_space<vmem>>, vector<128x32xf32>
    %36 = tpu.transpose %35, [1, 0] : vector<128x32xf32> -> vector<32x128xf32>
    %c0_30 = arith.constant 0 : index
    %c640_31 = arith.constant 640 : index
    %37 = vector.load %arg1[%c0_30, %c640_31] : memref<32x1024xf32, #tpu.memory_space<vmem>>, vector<32x128xf32>
    %38 = arith.addf %36, %37 : vector<32x128xf32>
    %cst_32 = arith.constant 3.000000e+00 : f32
    %39 = vector.broadcast %cst_32 : f32 to vector<32x128xf32>
    %40 = arith.addf %38, %39 : vector<32x128xf32>
    %c0_33 = arith.constant 0 : index
    %c640_34 = arith.constant 640 : index
    %41 = vector.load %arg2[%c0_33, %c640_34] : memref<32x1024xf32, #tpu.memory_space<vmem>>, vector<32x128xf32>
    tpu.vector_store %arg2[%c0_33, %c640_34], %40 {strides = array<i32>} : memref<32x1024xf32, #tpu.memory_space<vmem>>, vector<32x128xf32>,
    %c768 = arith.constant 768 : index
    %c0_35 = arith.constant 0 : index
    %42 = vector.load %arg0[%c768, %c0_35] : memref<1024x32xf32, #tpu.memory_space<vmem>>, vector<128x32xf32>
    %43 = tpu.transpose %42, [1, 0] : vector<128x32xf32> -> vector<32x128xf32>
    %c0_36 = arith.constant 0 : index
    %c768_37 = arith.constant 768 : index
    %44 = vector.load %arg1[%c0_36, %c768_37] : memref<32x1024xf32, #tpu.memory_space<vmem>>, vector<32x128xf32>
    %45 = arith.addf %43, %44 : vector<32x128xf32>
    %cst_38 = arith.constant 3.000000e+00 : f32
    %46 = vector.broadcast %cst_38 : f32 to vector<32x128xf32>
    %47 = arith.addf %45, %46 : vector<32x128xf32>
    %c0_39 = arith.constant 0 : index
    %c768_40 = arith.constant 768 : index
    %48 = vector.load %arg2[%c0_39, %c768_40] : memref<32x1024xf32, #tpu.memory_space<vmem>>, vector<32x128xf32>
    tpu.vector_store %arg2[%c0_39, %c768_40], %47 {strides = array<i32>} : memref<32x1024xf32, #tpu.memory_space<vmem>>, vector<32x128xf32>,
    %c896 = arith.constant 896 : index
    %c0_41 = arith.constant 0 : index
    %49 = vector.load %arg0[%c896, %c0_41] : memref<1024x32xf32, #tpu.memory_space<vmem>>, vector<128x32xf32>
    %50 = tpu.transpose %49, [1, 0] : vector<128x32xf32> -> vector<32x128xf32>
    %c0_42 = arith.constant 0 : index
    %c896_43 = arith.constant 896 : index
    %51 = vector.load %arg1[%c0_42, %c896_43] : memref<32x1024xf32, #tpu.memory_space<vmem>>, vector<32x128xf32>
    %52 = arith.addf %50, %51 : vector<32x128xf32>
    %cst_44 = arith.constant 3.000000e+00 : f32
    %53 = vector.broadcast %cst_44 : f32 to vector<32x128xf32>
    %54 = arith.addf %52, %53 : vector<32x128xf32>
    %c0_45 = arith.constant 0 : index
    %c896_46 = arith.constant 896 : index
    %55 = vector.load %arg2[%c0_45, %c896_46] : memref<32x1024xf32, #tpu.memory_space<vmem>>, vector<32x128xf32>
    tpu.vector_store %arg2[%c0_45, %c896_46], %54 {strides = array<i32>} : memref<32x1024xf32, #tpu.memory_space<vmem>>, vector<32x128xf32>,
    return
  }
}

</mosaic_0001>

<bundles_post_ra>
// kernel: model_forward.1
= control target key start
LH: loop header
LB: loop body
LE: loop exit
PB: predicated region body
PF: predicated region fallthrough
CT: control target
= control target key end

     0   :  { %s1118_s0 = inlined_call_operand.vmem [shape: f32[1024,32], index: 0, kind: input, shape index: {}]   ;;  %s1119_s1 = inlined_call_operand.vmem [shape: f32[32,1024], index: 1, kind: input, shape index: {}]   ;;  %s1120_s2 = inlined_call_operand.vmem [shape: f32[32,1024], index: 2, kind: output, shape index: {}]  }
   0x1   :  { %v75_v0 = vld [vmem:[%s1118_s0 + $0x80] sm:$0xff]  ;;  %v76_v2 = vld [vmem:[%s1118_s0 + $0x88] sm:$0xff]  ;;  %v77_v4 = vld [vmem:[%s1118_s0 + $0x90] sm:$0xff] }
   0x2   :  { %v11_v1 = vld [vmem:[%s1118_s0] sm:$0xff]  ;;  %91 = vxpose.xlu1.b32.start [1/16] (narrow) %v75_v0, 32  ;;  %v12_v3 = vld [vmem:[%s1118_s0 + $0x8] sm:$0xff]  ;;  %v13_v5 = vld [vmem:[%s1118_s0 + $0x10] sm:$0xff] }
   0x3   :  { %27 = vxpose.xlu0.b32.start [1/16] (narrow) %v11_v1, 32  ;;  %v78_v6 = vld [vmem:[%s1118_s0 + $0x98] sm:$0xff]  ;;  %v79_v8 = vld [vmem:[%s1118_s0 + $0xa0] sm:$0xff]  ;;  %v80_v10 = vld [vmem:[%s1118_s0 + $0xa8] sm:$0xff] }
   0x4   :  { %v14_v7 = vld [vmem:[%s1118_s0 + $0x18] sm:$0xff]  ;;  %v15_v9 = vld [vmem:[%s1118_s0 + $0x20] sm:$0xff]  ;;  %v16_v11 = vld [vmem:[%s1118_s0 + $0x28] sm:$0xff] }
   0x5   :  { %v81_v12 = vld [vmem:[%s1118_s0 + $0xb0] sm:$0xff]  ;;  %v82_v14 = vld [vmem:[%s1118_s0 + $0xb8] sm:$0xff]  ;;  %v83_v16 = vld [vmem:[%s1118_s0 + $0xc0] sm:$0xff] }
   0x6   :  { %92 = vxpose.xlu1.b32.cont [2/16] (narrow) %v76_v2, 32  ;;  %v17_v13 = vld [vmem:[%s1118_s0 + $0x30] sm:$0xff]  ;;  %v18_v15 = vld [vmem:[%s1118_s0 + $0x38] sm:$0xff]  ;;  %v19_v17 = vld [vmem:[%s1118_s0 + $0x40] sm:$0xff] }
   0x7   :  { %28 = vxpose.xlu0.b32.cont [2/16] (narrow) %v12_v3, 32  ;;  %v84_v18 = vld [vmem:[%s1118_s0 + $0xc8] sm:$0xff]  ;;  %v85_v20 = vld [vmem:[%s1118_s0 + $0xd0] sm:$0xff]  ;;  %v86_v22 = vld [vmem:[%s1118_s0 + $0xd8] sm:$0xff] }
   0x8   :  { %v20_v19 = vld [vmem:[%s1118_s0 + $0x48] sm:$0xff]  ;;  %v21_v21 = vld [vmem:[%s1118_s0 + $0x50] sm:$0xff]  ;;  %v22_v23 = vld [vmem:[%s1118_s0 + $0x58] sm:$0xff] }
   0x9   :  { %v87_v24 = vld [vmem:[%s1118_s0 + $0xe0] sm:$0xff]  ;;  %v88_v26 = vld [vmem:[%s1118_s0 + $0xe8] sm:$0xff]  ;;  %v89_v28 = vld [vmem:[%s1118_s0 + $0xf0] sm:$0xff] }
   0xa   :  { %93 = vxpose.xlu1.b32.cont [3/16] (narrow) %v77_v4, 32  ;;  %v23_v25 = vld [vmem:[%s1118_s0 + $0x60] sm:$0xff]  ;;  %v24_v27 = vld [vmem:[%s1118_s0 + $0x68] sm:$0xff]  ;;  %v25_v29 = vld [vmem:[%s1118_s0 + $0x70] sm:$0xff] }
   0xb   :  { %29 = vxpose.xlu0.b32.cont [3/16] (narrow) %v13_v5, 32  ;;  %v90_v30 = vld [vmem:[%s1118_s0 + $0xf8] sm:$0xff]  ;;  %v203_v32 = vld [vmem:[%s1118_s0 + $0x180] sm:$0xff]  ;;  %v204_v34 = vld [vmem:[%s1118_s0 + $0x188] sm:$0xff] }
   0xc   :  { %v26_v31 = vld [vmem:[%s1118_s0 + $0x78] sm:$0xff]  ;;  %v139_v33 = vld [vmem:[%s1118_s0 + $0x100] sm:$0xff]  ;;  %v140_v35 = vld [vmem:[%s1118_s0 + $0x108] sm:$0xff] }
   0xd   :  { %v205_v36 = vld [vmem:[%s1118_s0 + $0x190] sm:$0xff]  ;;  %v206_v38 = vld [vmem:[%s1118_s0 + $0x198] sm:$0xff]  ;;  %v207_v40 = vld [vmem:[%s1118_s0 + $0x1a0] sm:$0xff] }
   0xe   :  { %94 = vxpose.xlu1.b32.cont [4/16] (narrow) %v78_v6, 32  ;;  %v141_v37 = vld [vmem:[%s1118_s0 + $0x110] sm:$0xff]  ;;  %v142_v39 = vld [vmem:[%s1118_s0 + $0x118] sm:$0xff]  ;;  %v143_v41 = vld [vmem:[%s1118_s0 + $0x120] sm:$0xff] }
   0xf   :  { %30 = vxpose.xlu0.b32.cont [4/16] (narrow) %v14_v7, 32  ;;  %v208_v42 = vld [vmem:[%s1118_s0 + $0x1a8] sm:$0xff]  ;;  %v209_v44 = vld [vmem:[%s1118_s0 + $0x1b0] sm:$0xff]  ;;  %v210_v46 = vld [vmem:[%s1118_s0 + $0x1b8] sm:$0xff] }
  0x10   :  { %v144_v43 = vld [vmem:[%s1118_s0 + $0x128] sm:$0xff]  ;;  %v145_v45 = vld [vmem:[%s1118_s0 + $0x130] sm:$0xff]  ;;  %v146_v47 = vld [vmem:[%s1118_s0 + $0x138] sm:$0xff] }
  0x11   :  { %v211_v48 = vld [vmem:[%s1118_s0 + $0x1c0] sm:$0xff]  ;;  %v212_v50 = vld [vmem:[%s1118_s0 + $0x1c8] sm:$0xff]  ;;  %v213_v52 = vld [vmem:[%s1118_s0 + $0x1d0] sm:$0xff] }
  0x12   :  { %95 = vxpose.xlu1.b32.cont [5/16] (narrow) %v79_v8, 32  ;;  %v147_v49 = vld [vmem:[%s1118_s0 + $0x140] sm:$0xff]  ;;  %v148_v51 = vld [vmem:[%s1118_s0 + $0x148] sm:$0xff]  ;;  %v149_v53 = vld [vmem:[%s1118_s0 + $0x150] sm:$0xff] }
  0x13   :  { %31 = vxpose.xlu0.b32.cont [5/16] (narrow) %v15_v9, 32  ;;  %v214_v54 = vld [vmem:[%s1118_s0 + $0x1d8] sm:$0xff]  ;;  %v215_v56 = vld [vmem:[%s1118_s0 + $0x1e0] sm:$0xff]  ;;  %v216_v58 = vld [vmem:[%s1118_s0 + $0x1e8] sm:$0xff] }
  0x14   :  { %v150_v55 = vld [vmem:[%s1118_s0 + $0x158] sm:$0xff]  ;;  %v151_v57 = vld [vmem:[%s1118_s0 + $0x160] sm:$0xff]  ;;  %v152_v59 = vld [vmem:[%s1118_s0 + $0x168] sm:$0xff] }
  0x15   :  { %v217_v60 = vld [vmem:[%s1118_s0 + $0x1f0] sm:$0xff]  ;;  %v218_v62 = vld [vmem:[%s1118_s0 + $0x1f8] sm:$0xff]  ;;  %v331_v0 = vld [vmem:[%s1118_s0 + $0x280] sm:$0xff] }
  0x16   :  { %96 = vxpose.xlu1.b32.cont [6/16] (narrow) %v80_v10, 32  ;;  %v153_v61 = vld [vmem:[%s1118_s0 + $0x170] sm:$0xff]  ;;  %v154_v63 = vld [vmem:[%s1118_s0 + $0x178] sm:$0xff]  ;;  %v267_v1 = vld [vmem:[%s1118_s0 + $0x200] sm:$0xff] }
  0x17   :  { %32 = vxpose.xlu0.b32.cont [6/16] (narrow) %v16_v11, 32  ;;  %v123_v2 = vld [vmem:[%s1119_s1 + $0x8] sm:$0xff]  ;;  %v59_v3 = vld [vmem:[%s1119_s1] sm:$0xff] }
  0x18   :  { %v332_v6 = vld [vmem:[%s1118_s0 + $0x288] sm:$0xff]  ;;  %v60_v11 = vld [vmem:[%s1119_s1 + $0x40] sm:$0xff] }
  0x19   :  { %v268_v7 = vld [vmem:[%s1118_s0 + $0x208] sm:$0xff] }
  0x1a   :  { %97 = vxpose.xlu1.b32.cont [7/16] (narrow) %v81_v12, 32  ;;  %v124_v10 = vld [vmem:[%s1119_s1 + $0x48] sm:$0xff] }
  0x1b   :  { %33 = vxpose.xlu0.b32.cont [7/16] (narrow) %v17_v13, 32 }
  0x1e   :  { %98 = vxpose.xlu1.b32.cont [8/16] (narrow) %v82_v14, 32 }
  0x1f   :  { %34 = vxpose.xlu0.b32.cont [8/16] (narrow) %v18_v15, 32 }
  0x22   :  { %99 = vxpose.xlu1.b32.cont [9/16] (narrow) %v83_v16, 32  ;;  %v333_v16 = vld [vmem:[%s1118_s0 + $0x290] sm:$0xff] }
  0x23   :  { %35 = vxpose.xlu0.b32.cont [9/16] (narrow) %v19_v17, 32  ;;  %v269_v17 = vld [vmem:[%s1118_s0 + $0x210] sm:$0xff] }
  0x26   :  { %100 = vxpose.xlu1.b32.cont [10/16] (narrow) %v84_v18, 32 }
  0x27   :  { %36 = vxpose.xlu0.b32.cont [10/16] (narrow) %v20_v19, 32 }
  0x2a   :  { %101 = vxpose.xlu1.b32.cont [11/16] (narrow) %v85_v20, 32  ;;  %v125_v20 = vld [vmem:[%s1119_s1 + $0x88] sm:$0xff] }
  0x2b   :  { %37 = vxpose.xlu0.b32.cont [11/16] (narrow) %v21_v21, 32  ;;  %v61_v21 = vld [vmem:[%s1119_s1 + $0x80] sm:$0xff] }
  0x2e   :  { %102 = vxpose.xlu1.b32.cont [12/16] (narrow) %v86_v22, 32 }
  0x2f   :  { %38 = vxpose.xlu0.b32.cont [12/16] (narrow) %v22_v23, 32 }
  0x32   :  { %103 = vxpose.xlu1.b32.cont [13/16] (narrow) %v87_v24, 32 }
  0x33   :  { %39 = vxpose.xlu0.b32.cont [13/16] (narrow) %v23_v25, 32 }
  0x36   :  { %104 = vxpose.xlu1.b32.cont [14/16] (narrow) %v88_v26, 32  ;;  %v334_v26 = vld [vmem:[%s1118_s0 + $0x298] sm:$0xff] }
  0x37   :  { %40 = vxpose.xlu0.b32.cont [14/16] (narrow) %v24_v27, 32  ;;  %v270_v27 = vld [vmem:[%s1118_s0 + $0x218] sm:$0xff] }
  0x3a   :  { %105 = vxpose.xlu1.b32.cont [15/16] (narrow) %v89_v28, 32 }
  0x3b   :  { %41 = vxpose.xlu0.b32.cont [15/16] (narrow) %v25_v29, 32 }
  0x3e   :  { %106 = vxpose.xlu1.b32.end [16/16] (narrow) %v90_v30, 32  ;;  %v126_v30 = vld [vmem:[%s1119_s1 + $0xc8] sm:$0xff] }
  0x3f   :  { %42 = vxpose.xlu0.b32.end [16/16] (narrow) %v26_v31, 32  ;;  %v62_v31 = vld [vmem:[%s1119_s1 + $0xc0] sm:$0xff] }
  0x42   :  { %219 = vxpose.xlu1.b32.start [1/16] (narrow) %v203_v32, 32 }
  0x43   :  { %155 = vxpose.xlu0.b32.start [1/16] (narrow) %v139_v33, 32 }
  0x46   :  { %220 = vxpose.xlu1.b32.cont [2/16] (narrow) %v204_v34, 32 }
  0x47   :  { %156 = vxpose.xlu0.b32.cont [2/16] (narrow) %v140_v35, 32 }
  0x4a   :  { %221 = vxpose.xlu1.b32.cont [3/16] (narrow) %v205_v36, 32  ;;  %v335_v36 = vld [vmem:[%s1118_s0 + $0x2a0] sm:$0xff] }
  0x4b   :  { %157 = vxpose.xlu0.b32.cont [3/16] (narrow) %v141_v37, 32  ;;  %v271_v37 = vld [vmem:[%s1118_s0 + $0x220] sm:$0xff] }
  0x4e   :  { %222 = vxpose.xlu1.b32.cont [4/16] (narrow) %v206_v38, 32 }
  0x4f   :  { %158 = vxpose.xlu0.b32.cont [4/16] (narrow) %v142_v39, 32 }
  0x52   :  { %223 = vxpose.xlu1.b32.cont [5/16] (narrow) %v207_v40, 32 }
  0x53   :  { %159 = vxpose.xlu0.b32.cont [5/16] (narrow) %v143_v41, 32 }
  0x56   :  { %224 = vxpose.xlu1.b32.cont [6/16] (narrow) %v208_v42, 32  ;;  %v336_v42 = vld [vmem:[%s1118_s0 + $0x2a8] sm:$0xff] }
  0x57   :  { %160 = vxpose.xlu0.b32.cont [6/16] (narrow) %v144_v43, 32  ;;  %v272_v43 = vld [vmem:[%s1118_s0 + $0x228] sm:$0xff] }
  0x5a   :  { %225 = vxpose.xlu1.b32.cont [7/16] (narrow) %v209_v44, 32  ;;  %v337_v44 = vld [vmem:[%s1118_s0 + $0x2b0] sm:$0xff] }
  0x5b   :  { %161 = vxpose.xlu0.b32.cont [7/16] (narrow) %v145_v45, 32  ;;  %v273_v45 = vld [vmem:[%s1118_s0 + $0x230] sm:$0xff] }
  0x5e   :  { %226 = vxpose.xlu1.b32.cont [8/16] (narrow) %v210_v46, 32  ;;  %v338_v46 = vld [vmem:[%s1118_s0 + $0x2b8] sm:$0xff] }
  0x5f   :  { %162 = vxpose.xlu0.b32.cont [8/16] (narrow) %v146_v47, 32  ;;  %v274_v47 = vld [vmem:[%s1118_s0 + $0x238] sm:$0xff] }
  0x62   :  { %227 = vxpose.xlu1.b32.cont [9/16] (narrow) %v211_v48, 32  ;;  %v339_v48 = vld [vmem:[%s1118_s0 + $0x2c0] sm:$0xff] }
  0x63   :  { %163 = vxpose.xlu0.b32.cont [9/16] (narrow) %v147_v49, 32  ;;  %v275_v49 = vld [vmem:[%s1118_s0 + $0x240] sm:$0xff] }
  0x66   :  { %228 = vxpose.xlu1.b32.cont [10/16] (narrow) %v212_v50, 32  ;;  %v340_v50 = vld [vmem:[%s1118_s0 + $0x2c8] sm:$0xff] }
  0x67   :  { %164 = vxpose.xlu0.b32.cont [10/16] (narrow) %v148_v51, 32  ;;  %v276_v51 = vld [vmem:[%s1118_s0 + $0x248] sm:$0xff] }
  0x6a   :  { %229 = vxpose.xlu1.b32.cont [11/16] (narrow) %v213_v52, 32  ;;  %v341_v52 = vld [vmem:[%s1118_s0 + $0x2d0] sm:$0xff] }
  0x6b   :  { %165 = vxpose.xlu0.b32.cont [11/16] (narrow) %v149_v53, 32  ;;  %v277_v53 = vld [vmem:[%s1118_s0 + $0x250] sm:$0xff] }
  0x6e   :  { %230 = vxpose.xlu1.b32.cont [12/16] (narrow) %v214_v54, 32  ;;  %v342_v54 = vld [vmem:[%s1118_s0 + $0x2d8] sm:$0xff] }
  0x6f   :  { %166 = vxpose.xlu0.b32.cont [12/16] (narrow) %v150_v55, 32  ;;  %v278_v55 = vld [vmem:[%s1118_s0 + $0x258] sm:$0xff] }
  0x72   :  { %231 = vxpose.xlu1.b32.cont [13/16] (narrow) %v215_v56, 32  ;;  %v343_v56 = vld [vmem:[%s1118_s0 + $0x2e0] sm:$0xff] }
  0x73   :  { %167 = vxpose.xlu0.b32.cont [13/16] (narrow) %v151_v57, 32  ;;  %v279_v57 = vld [vmem:[%s1118_s0 + $0x260] sm:$0xff] }
  0x76   :  { %232 = vxpose.xlu1.b32.cont [14/16] (narrow) %v216_v58, 32  ;;  %v344_v58 = vld [vmem:[%s1118_s0 + $0x2e8] sm:$0xff] }
  0x77   :  { %168 = vxpose.xlu0.b32.cont [14/16] (narrow) %v152_v59, 32  ;;  %v280_v59 = vld [vmem:[%s1118_s0 + $0x268] sm:$0xff] }
  0x7a   :  { %233 = vxpose.xlu1.b32.cont [15/16] (narrow) %v217_v60, 32  ;;  %v345_v60 = vld [vmem:[%s1118_s0 + $0x2f0] sm:$0xff] }
  0x7b   :  { %169 = vxpose.xlu0.b32.cont [15/16] (narrow) %v153_v61, 32  ;;  %v281_v61 = vld [vmem:[%s1118_s0 + $0x270] sm:$0xff] }
  0x7e   :  { %234 = vxpose.xlu1.b32.end [16/16] (narrow) %v218_v62, 32  ;;  %v346_v62 = vld [vmem:[%s1118_s0 + $0x2f8] sm:$0xff] }
  0x7f   :  { %170 = vxpose.xlu0.b32.end [16/16] (narrow) %v154_v63, 32  ;;  %v282_v63 = vld [vmem:[%s1118_s0 + $0x278] sm:$0xff] }
  0x82   :  { %347 = vxpose.xlu1.b32.start [1/16] (narrow) %v331_v0, 32  ;;  %v107_v4 = vpop.trf.xlu1  ;;  %v459_v0 = vld [vmem:[%s1118_s0 + $0x380] sm:$0xff] }
  0x83   :  { %283 = vxpose.xlu0.b32.start [1/16] (narrow) %v267_v1, 32  ;;  %v43_v5 = vpop.trf.xlu0  ;;  %v127_v8 = vadd.f32 %v123_v2, %v107_v4  ;;  %v395_v1 = vld [vmem:[%s1118_s0 + $0x300] sm:$0xff]  ;;  %v251_v2 = vld [vmem:[%s1119_s1 + $0x18] sm:$0xff] }
  0x84   :  { %v63_v9 = vadd.f32 %v59_v3, %v43_v5  ;;  %v187_v3 = vld [vmem:[%s1119_s1 + $0x10] sm:$0xff] }
  0x85   :  { %v131_v12 = vadd.f32 3.0, %v127_v8 }
  0x86   :  { %v67_v13 = vadd.f32 3.0, %v63_v9  ;;  %348 = vxpose.xlu1.b32.cont [2/16] (narrow) %v332_v6, 32  ;;  %v108_v14 = vpop.trf.xlu1  ;;  %v460_v6 = vld [vmem:[%s1118_s0 + $0x388] sm:$0xff] }
  0x87   :  { %284 = vxpose.xlu0.b32.cont [2/16] (narrow) %v268_v7, 32  ;;  %v44_v15 = vpop.trf.xlu0  ;;  %135 = vst [vmem:[%s1120_s2 + $0x8] sm:$0xff] %v131_v12  ;;  %v128_v18 = vadd.f32 %v124_v10, %v108_v14  ;;  %v396_v7 = vld [vmem:[%s1118_s0 + $0x308] sm:$0xff]  ;;  %v252_v10 = vld [vmem:[%s1119_s1 + $0x58] sm:$0xff] }
  0x88   :  { %71 = vst [vmem:[%s1120_s2] sm:$0xff] %v67_v13  ;;  %v64_v19 = vadd.f32 %v60_v11, %v44_v15  ;;  %v188_v11 = vld [vmem:[%s1119_s1 + $0x50] sm:$0xff] }
  0x89   :  { %v132_v22 = vadd.f32 3.0, %v128_v18 }
  0x8a   :  { %v68_v23 = vadd.f32 3.0, %v64_v19  ;;  %349 = vxpose.xlu1.b32.cont [3/16] (narrow) %v333_v16, 32  ;;  %v109_v24 = vpop.trf.xlu1  ;;  %v461_v16 = vld [vmem:[%s1118_s0 + $0x390] sm:$0xff] }
  0x8b   :  { %285 = vxpose.xlu0.b32.cont [3/16] (narrow) %v269_v17, 32  ;;  %v45_v25 = vpop.trf.xlu0  ;;  %136 = vst [vmem:[%s1120_s2 + $0x48] sm:$0xff] %v132_v22  ;;  %v129_v28 = vadd.f32 %v125_v20, %v109_v24  ;;  %v397_v17 = vld [vmem:[%s1118_s0 + $0x310] sm:$0xff]  ;;  %v253_v20 = vld [vmem:[%s1119_s1 + $0x98] sm:$0xff] }
  0x8c   :  { %72 = vst [vmem:[%s1120_s2 + $0x40] sm:$0xff] %v68_v23  ;;  %v65_v29 = vadd.f32 %v61_v21, %v45_v25  ;;  %v189_v21 = vld [vmem:[%s1119_s1 + $0x90] sm:$0xff] }
  0x8d   :  { %v133_v32 = vadd.f32 3.0, %v129_v28 }
  0x8e   :  { %v69_v33 = vadd.f32 3.0, %v65_v29  ;;  %350 = vxpose.xlu1.b32.cont [4/16] (narrow) %v334_v26, 32  ;;  %v110_v34 = vpop.trf.xlu1  ;;  %v462_v26 = vld [vmem:[%s1118_s0 + $0x398] sm:$0xff] }
  0x8f   :  { %286 = vxpose.xlu0.b32.cont [4/16] (narrow) %v270_v27, 32  ;;  %v46_v35 = vpop.trf.xlu0  ;;  %137 = vst [vmem:[%s1120_s2 + $0x88] sm:$0xff] %v133_v32  ;;  %v130_v38 = vadd.f32 %v126_v30, %v110_v34  ;;  %v398_v27 = vld [vmem:[%s1118_s0 + $0x318] sm:$0xff] }
  0x90   :  { %73 = vst [vmem:[%s1120_s2 + $0x80] sm:$0xff] %v69_v33  ;;  %v66_v39 = vadd.f32 %v62_v31, %v46_v35  ;;  %v254_v30 = vld [vmem:[%s1119_s1 + $0xd8] sm:$0xff]  ;;  %v190_v31 = vld [vmem:[%s1119_s1 + $0xd0] sm:$0xff] }
  0x91   :  { %v134_v40 = vadd.f32 3.0, %v130_v38 }
  0x92   :  { %v70_v41 = vadd.f32 3.0, %v66_v39  ;;  %351 = vxpose.xlu1.b32.cont [5/16] (narrow) %v335_v36, 32  ;;  %v463_v36 = vld [vmem:[%s1118_s0 + $0x3a0] sm:$0xff] }
  0x93   :  { %287 = vxpose.xlu0.b32.cont [5/16] (narrow) %v271_v37, 32  ;;  %138 = vst [vmem:[%s1120_s2 + $0xc8] sm:$0xff] %v134_v40  ;;  %v399_v37 = vld [vmem:[%s1118_s0 + $0x320] sm:$0xff] }
  0x94   :  { %74 = vst [vmem:[%s1120_s2 + $0xc0] sm:$0xff] %v70_v41 }
  0x96   :  { %352 = vxpose.xlu1.b32.cont [6/16] (narrow) %v336_v42, 32  ;;  %v464_v42 = vld [vmem:[%s1118_s0 + $0x3a8] sm:$0xff] }
  0x97   :  { %288 = vxpose.xlu0.b32.cont [6/16] (narrow) %v272_v43, 32  ;;  %v400_v43 = vld [vmem:[%s1118_s0 + $0x328] sm:$0xff] }
  0x9a   :  { %353 = vxpose.xlu1.b32.cont [7/16] (narrow) %v337_v44, 32  ;;  %v465_v44 = vld [vmem:[%s1118_s0 + $0x3b0] sm:$0xff] }
  0x9b   :  { %289 = vxpose.xlu0.b32.cont [7/16] (narrow) %v273_v45, 32  ;;  %v401_v45 = vld [vmem:[%s1118_s0 + $0x330] sm:$0xff] }
  0x9e   :  { %354 = vxpose.xlu1.b32.cont [8/16] (narrow) %v338_v46, 32  ;;  %v466_v46 = vld [vmem:[%s1118_s0 + $0x3b8] sm:$0xff] }
  0x9f   :  { %290 = vxpose.xlu0.b32.cont [8/16] (narrow) %v274_v47, 32  ;;  %v402_v47 = vld [vmem:[%s1118_s0 + $0x338] sm:$0xff] }
  0xa2   :  { %355 = vxpose.xlu1.b32.cont [9/16] (narrow) %v339_v48, 32  ;;  %v467_v48 = vld [vmem:[%s1118_s0 + $0x3c0] sm:$0xff] }
  0xa3   :  { %291 = vxpose.xlu0.b32.cont [9/16] (narrow) %v275_v49, 32  ;;  %v403_v49 = vld [vmem:[%s1118_s0 + $0x340] sm:$0xff] }
  0xa6   :  { %356 = vxpose.xlu1.b32.cont [10/16] (narrow) %v340_v50, 32  ;;  %v468_v50 = vld [vmem:[%s1118_s0 + $0x3c8] sm:$0xff] }
  0xa7   :  { %292 = vxpose.xlu0.b32.cont [10/16] (narrow) %v276_v51, 32  ;;  %v404_v51 = vld [vmem:[%s1118_s0 + $0x348] sm:$0xff] }
  0xaa   :  { %357 = vxpose.xlu1.b32.cont [11/16] (narrow) %v341_v52, 32  ;;  %v469_v52 = vld [vmem:[%s1118_s0 + $0x3d0] sm:$0xff] }
  0xab   :  { %293 = vxpose.xlu0.b32.cont [11/16] (narrow) %v277_v53, 32  ;;  %v405_v53 = vld [vmem:[%s1118_s0 + $0x350] sm:$0xff] }
  0xae   :  { %358 = vxpose.xlu1.b32.cont [12/16] (narrow) %v342_v54, 32  ;;  %v470_v54 = vld [vmem:[%s1118_s0 + $0x3d8] sm:$0xff] }
  0xaf   :  { %294 = vxpose.xlu0.b32.cont [12/16] (narrow) %v278_v55, 32  ;;  %v406_v55 = vld [vmem:[%s1118_s0 + $0x358] sm:$0xff] }
  0xb2   :  { %359 = vxpose.xlu1.b32.cont [13/16] (narrow) %v343_v56, 32  ;;  %v471_v56 = vld [vmem:[%s1118_s0 + $0x3e0] sm:$0xff] }
  0xb3   :  { %295 = vxpose.xlu0.b32.cont [13/16] (narrow) %v279_v57, 32  ;;  %v407_v57 = vld [vmem:[%s1118_s0 + $0x360] sm:$0xff] }
  0xb6   :  { %360 = vxpose.xlu1.b32.cont [14/16] (narrow) %v344_v58, 32  ;;  %v472_v58 = vld [vmem:[%s1118_s0 + $0x3e8] sm:$0xff] }
  0xb7   :  { %296 = vxpose.xlu0.b32.cont [14/16] (narrow) %v280_v59, 32  ;;  %v408_v59 = vld [vmem:[%s1118_s0 + $0x368] sm:$0xff] }
  0xba   :  { %361 = vxpose.xlu1.b32.cont [15/16] (narrow) %v345_v60, 32  ;;  %v473_v60 = vld [vmem:[%s1118_s0 + $0x3f0] sm:$0xff] }
  0xbb   :  { %297 = vxpose.xlu0.b32.cont [15/16] (narrow) %v281_v61, 32  ;;  %v409_v61 = vld [vmem:[%s1118_s0 + $0x370] sm:$0xff] }
  0xbe   :  { %362 = vxpose.xlu1.b32.end [16/16] (narrow) %v346_v62, 32  ;;  %v474_v62 = vld [vmem:[%s1118_s0 + $0x3f8] sm:$0xff] }
  0xbf   :  { %298 = vxpose.xlu0.b32.end [16/16] (narrow) %v282_v63, 32  ;;  %v410_v63 = vld [vmem:[%s1118_s0 + $0x378] sm:$0xff] }
  0xc2   :  { %475 = vxpose.xlu1.b32.start [1/16] (narrow) %v459_v0, 32  ;;  %v235_v4 = vpop.trf.xlu1  ;;  %v379_v0 = vld [vmem:[%s1119_s1 + $0x28] sm:$0xff] }
  0xc3   :  { %411 = vxpose.xlu0.b32.start [1/16] (narrow) %v395_v1, 32  ;;  %v171_v5 = vpop.trf.xlu0  ;;  %v255_v8 = vadd.f32 %v251_v2, %v235_v4  ;;  %v315_v1 = vld [vmem:[%s1119_s1 + $0x20] sm:$0xff] }
  0xc4   :  { %v191_v9 = vadd.f32 %v187_v3, %v171_v5 }
  0xc5   :  { %v259_v12 = vadd.f32 3.0, %v255_v8 }
  0xc6   :  { %v195_v13 = vadd.f32 3.0, %v191_v9  ;;  %476 = vxpose.xlu1.b32.cont [2/16] (narrow) %v460_v6, 32  ;;  %v236_v14 = vpop.trf.xlu1  ;;  %v380_v6 = vld [vmem:[%s1119_s1 + $0x68] sm:$0xff] }
  0xc7   :  { %412 = vxpose.xlu0.b32.cont [2/16] (narrow) %v396_v7, 32  ;;  %v172_v15 = vpop.trf.xlu0  ;;  %263 = vst [vmem:[%s1120_s2 + $0x18] sm:$0xff] %v259_v12  ;;  %v256_v18 = vadd.f32 %v252_v10, %v236_v14  ;;  %v316_v7 = vld [vmem:[%s1119_s1 + $0x60] sm:$0xff]  ;;  %v381_v14 = vld [vmem:[%s1119_s1 + $0xa8] sm:$0xff] }
  0xc8   :  { %199 = vst [vmem:[%s1120_s2 + $0x10] sm:$0xff] %v195_v13  ;;  %v192_v19 = vadd.f32 %v188_v11, %v172_v15  ;;  %v317_v15 = vld [vmem:[%s1119_s1 + $0xa0] sm:$0xff] }
  0xc9   :  { %v260_v22 = vadd.f32 3.0, %v256_v18 }
  0xca   :  { %v196_v23 = vadd.f32 3.0, %v192_v19  ;;  %477 = vxpose.xlu1.b32.cont [3/16] (narrow) %v461_v16, 32  ;;  %v237_v24 = vpop.trf.xlu1 }
  0xcb   :  { %413 = vxpose.xlu0.b32.cont [3/16] (narrow) %v397_v17, 32  ;;  %v173_v25 = vpop.trf.xlu0  ;;  %264 = vst [vmem:[%s1120_s2 + $0x58] sm:$0xff] %v260_v22  ;;  %v257_v28 = vadd.f32 %v253_v20, %v237_v24  ;;  %v382_v22 = vld [vmem:[%s1119_s1 + $0xe8] sm:$0xff] }
  0xcc   :  { %200 = vst [vmem:[%s1120_s2 + $0x50] sm:$0xff] %v196_v23  ;;  %v193_v29 = vadd.f32 %v189_v21, %v173_v25  ;;  %v318_v23 = vld [vmem:[%s1119_s1 + $0xe0] sm:$0xff] }
  0xcd   :  { %v261_v32 = vadd.f32 3.0, %v257_v28 }
  0xce   :  { %v197_v33 = vadd.f32 3.0, %v193_v29  ;;  %478 = vxpose.xlu1.b32.cont [4/16] (narrow) %v462_v26, 32  ;;  %v238_v34 = vpop.trf.xlu1 }
  0xcf   :  { %414 = vxpose.xlu0.b32.cont [4/16] (narrow) %v398_v27, 32  ;;  %v174_v35 = vpop.trf.xlu0  ;;  %265 = vst [vmem:[%s1120_s2 + $0x98] sm:$0xff] %v261_v32  ;;  %v258_v38 = vadd.f32 %v254_v30, %v238_v34  ;;  %v507_v32 = vld [vmem:[%s1119_s1 + $0x38] sm:$0xff] }
  0xd0   :  { %201 = vst [vmem:[%s1120_s2 + $0x90] sm:$0xff] %v197_v33  ;;  %v194_v39 = vadd.f32 %v190_v31, %v174_v35  ;;  %v443_v33 = vld [vmem:[%s1119_s1 + $0x30] sm:$0xff] }
  0xd1   :  { %v262_v40 = vadd.f32 3.0, %v258_v38  ;;  %v508_v38 = vld [vmem:[%s1119_s1 + $0x78] sm:$0xff] }
  0xd2   :  { %v198_v41 = vadd.f32 3.0, %v194_v39  ;;  %479 = vxpose.xlu1.b32.cont [5/16] (narrow) %v463_v36, 32  ;;  %v444_v39 = vld [vmem:[%s1119_s1 + $0x70] sm:$0xff] }
  0xd3   :  { %415 = vxpose.xlu0.b32.cont [5/16] (narrow) %v399_v37, 32  ;;  %266 = vst [vmem:[%s1120_s2 + $0xd8] sm:$0xff] %v262_v40 }
  0xd4   :  { %202 = vst [vmem:[%s1120_s2 + $0xd0] sm:$0xff] %v198_v41 }
  0xd6   :  { %480 = vxpose.xlu1.b32.cont [6/16] (narrow) %v464_v42, 32 }
  0xd7   :  { %416 = vxpose.xlu0.b32.cont [6/16] (narrow) %v400_v43, 32 }
  0xda   :  { %481 = vxpose.xlu1.b32.cont [7/16] (narrow) %v465_v44, 32 }
  0xdb   :  { %417 = vxpose.xlu0.b32.cont [7/16] (narrow) %v401_v45, 32 }
  0xde   :  { %482 = vxpose.xlu1.b32.cont [8/16] (narrow) %v466_v46, 32  ;;  %v509_v46 = vld [vmem:[%s1119_s1 + $0xb8] sm:$0xff] }
  0xdf   :  { %418 = vxpose.xlu0.b32.cont [8/16] (narrow) %v402_v47, 32  ;;  %v445_v47 = vld [vmem:[%s1119_s1 + $0xb0] sm:$0xff] }
  0xe2   :  { %483 = vxpose.xlu1.b32.cont [9/16] (narrow) %v467_v48, 32 }
  0xe3   :  { %419 = vxpose.xlu0.b32.cont [9/16] (narrow) %v403_v49, 32 }
  0xe6   :  { %484 = vxpose.xlu1.b32.cont [10/16] (narrow) %v468_v50, 32 }
  0xe7   :  { %420 = vxpose.xlu0.b32.cont [10/16] (narrow) %v404_v51, 32 }
  0xea   :  { %485 = vxpose.xlu1.b32.cont [11/16] (narrow) %v469_v52, 32 }
  0xeb   :  { %421 = vxpose.xlu0.b32.cont [11/16] (narrow) %v405_v53, 32 }
  0xee   :  { %486 = vxpose.xlu1.b32.cont [12/16] (narrow) %v470_v54, 32  ;;  %v510_v54 = vld [vmem:[%s1119_s1 + $0xf8] sm:$0xff] }
  0xef   :  { %422 = vxpose.xlu0.b32.cont [12/16] (narrow) %v406_v55, 32  ;;  %v446_v55 = vld [vmem:[%s1119_s1 + $0xf0] sm:$0xff] }
  0xf2   :  { %487 = vxpose.xlu1.b32.cont [13/16] (narrow) %v471_v56, 32 }
  0xf3   :  { %423 = vxpose.xlu0.b32.cont [13/16] (narrow) %v407_v57, 32 }
  0xf6   :  { %488 = vxpose.xlu1.b32.cont [14/16] (narrow) %v472_v58, 32 }
  0xf7   :  { %424 = vxpose.xlu0.b32.cont [14/16] (narrow) %v408_v59, 32 }
  0xfa   :  { %489 = vxpose.xlu1.b32.cont [15/16] (narrow) %v473_v60, 32 }
  0xfb   :  { %425 = vxpose.xlu0.b32.cont [15/16] (narrow) %v409_v61, 32 }
  0xfe   :  { %490 = vxpose.xlu1.b32.end [16/16] (narrow) %v474_v62, 32 }
  0xff   :  { %426 = vxpose.xlu0.b32.end [16/16] (narrow) %v410_v63, 32 }
 0x102   :  { %v363_v2 = vpop.trf.xlu1 }
 0x103   :  { %v299_v3 = vpop.trf.xlu0  ;;  %v383_v4 = vadd.f32 %v379_v0, %v363_v2 }
 0x104   :  { %v319_v5 = vadd.f32 %v315_v1, %v299_v3 }
 0x105   :  { %v387_v8 = vadd.f32 3.0, %v383_v4 }
 0x106   :  { %v323_v9 = vadd.f32 3.0, %v319_v5  ;;  %v364_v10 = vpop.trf.xlu1 }
 0x107   :  { %v300_v11 = vpop.trf.xlu0  ;;  %391 = vst [vmem:[%s1120_s2 + $0x28] sm:$0xff] %v387_v8  ;;  %v384_v12 = vadd.f32 %v380_v6, %v364_v10 }
 0x108   :  { %327 = vst [vmem:[%s1120_s2 + $0x20] sm:$0xff] %v323_v9  ;;  %v320_v13 = vadd.f32 %v316_v7, %v300_v11 }
 0x109   :  { %v388_v16 = vadd.f32 3.0, %v384_v12 }
 0x10a   :  { %v324_v17 = vadd.f32 3.0, %v320_v13  ;;  %v365_v18 = vpop.trf.xlu1 }
 0x10b   :  { %v301_v19 = vpop.trf.xlu0  ;;  %392 = vst [vmem:[%s1120_s2 + $0x68] sm:$0xff] %v388_v16  ;;  %v385_v20 = vadd.f32 %v381_v14, %v365_v18 }
 0x10c   :  { %328 = vst [vmem:[%s1120_s2 + $0x60] sm:$0xff] %v324_v17  ;;  %v321_v21 = vadd.f32 %v317_v15, %v301_v19 }
 0x10d   :  { %v389_v24 = vadd.f32 3.0, %v385_v20 }
 0x10e   :  { %v325_v25 = vadd.f32 3.0, %v321_v21  ;;  %v366_v26 = vpop.trf.xlu1 }
 0x10f   :  { %v302_v27 = vpop.trf.xlu0  ;;  %393 = vst [vmem:[%s1120_s2 + $0xa8] sm:$0xff] %v389_v24  ;;  %v386_v28 = vadd.f32 %v382_v22, %v366_v26 }
 0x110   :  { %329 = vst [vmem:[%s1120_s2 + $0xa0] sm:$0xff] %v325_v25  ;;  %v322_v29 = vadd.f32 %v318_v23, %v302_v27 }
 0x111   :  { %v390_v30 = vadd.f32 3.0, %v386_v28 }
 0x112   :  { %v326_v31 = vadd.f32 3.0, %v322_v29 }
 0x113   :  { %394 = vst [vmem:[%s1120_s2 + $0xe8] sm:$0xff] %v390_v30 }
 0x114   :  { %330 = vst [vmem:[%s1120_s2 + $0xe0] sm:$0xff] %v326_v31 }
 0x142   :  { %v491_v34 = vpop.trf.xlu1 }
 0x143   :  { %v427_v35 = vpop.trf.xlu0  ;;  %v511_v36 = vadd.f32 %v507_v32, %v491_v34 }
 0x144   :  { %v447_v37 = vadd.f32 %v443_v33, %v427_v35 }
 0x145   :  { %v515_v40 = vadd.f32 3.0, %v511_v36 }
 0x146   :  { %v451_v41 = vadd.f32 3.0, %v447_v37  ;;  %v492_v42 = vpop.trf.xlu1 }
 0x147   :  { %v428_v43 = vpop.trf.xlu0  ;;  %519 = vst [vmem:[%s1120_s2 + $0x38] sm:$0xff] %v515_v40  ;;  %v512_v44 = vadd.f32 %v508_v38, %v492_v42 }
 0x148   :  { %455 = vst [vmem:[%s1120_s2 + $0x30] sm:$0xff] %v451_v41  ;;  %v448_v45 = vadd.f32 %v444_v39, %v428_v43 }
 0x149   :  { %v516_v48 = vadd.f32 3.0, %v512_v44 }
 0x14a   :  { %v452_v49 = vadd.f32 3.0, %v448_v45  ;;  %v493_v50 = vpop.trf.xlu1 }
 0x14b   :  { %v429_v51 = vpop.trf.xlu0  ;;  %520 = vst [vmem:[%s1120_s2 + $0x78] sm:$0xff] %v516_v48  ;;  %v513_v52 = vadd.f32 %v509_v46, %v493_v50 }
 0x14c   :  { %456 = vst [vmem:[%s1120_s2 + $0x70] sm:$0xff] %v452_v49  ;;  %v449_v53 = vadd.f32 %v445_v47, %v429_v51 }
 0x14d   :  { %v517_v56 = vadd.f32 3.0, %v513_v52 }
 0x14e   :  { %v453_v57 = vadd.f32 3.0, %v449_v53  ;;  %v494_v58 = vpop.trf.xlu1 }
 0x14f   :  { %v430_v59 = vpop.trf.xlu0  ;;  %521 = vst [vmem:[%s1120_s2 + $0xb8] sm:$0xff] %v517_v56  ;;  %v514_v60 = vadd.f32 %v510_v54, %v494_v58 }
 0x150   :  { %457 = vst [vmem:[%s1120_s2 + $0xb0] sm:$0xff] %v453_v57  ;;  %v450_v61 = vadd.f32 %v446_v55, %v430_v59 }
 0x151   :  { %v518_v62 = vadd.f32 3.0, %v514_v60 }
 0x152   :  { %v454_v63 = vadd.f32 3.0, %v450_v61 }
 0x153   :  { %522 = vst [vmem:[%s1120_s2 + $0xf8] sm:$0xff] %v518_v62 }
 0x154   :  { %458 = vst [vmem:[%s1120_s2 + $0xf0] sm:$0xff] %v454_v63 }

</bundles_post_ra>
